<compile_context>
chip_gen: v6e
topology: v6e:2x2x1
jax: 0.10.0
libtpu: 0.0.40
codegen_flags: <defaults>
</compile_context>

<pallas_src>
import functools

import jax
import jax.numpy as jnp
import numpy as np
from jax import lax
from jax.experimental import pallas as pl
from jax.experimental.pallas import tpu as pltpu

LANE = 128


def _round_up(x, m):
    return ((x + m - 1) // m) * m


def _mosaic_params(semantics, block_bytes):
    # Explicit scoped-VMEM limit sized from the per-step block footprint
    # (x3 for multi-buffering + internal scratch headroom), clamped well under
    # v7x's 64 MiB physical VMEM.  Avoids relying on the 16/32 MiB defaults.
    limit = int(min(max(3 * block_bytes + (2 << 20), 8 << 20), 48 << 20))
    return pltpu.CompilerParams(dimension_semantics=semantics,
                                vmem_limit_bytes=limit)


# ---------------------------------------------------------------------------
# Generic tiled matmul + bias kernel (hoisted input gates / vocab projection).
# Operands arrive in bf16 (MXU-native), accumulation is f32.
# ---------------------------------------------------------------------------
def _matmul_bias_kernel(x_ref, w_ref, b_ref, o_ref):
    acc = jnp.dot(x_ref[...], w_ref[...], preferred_element_type=jnp.float32)
    o_ref[...] = (acc + b_ref[...]).astype(o_ref.dtype)


def _matmul_bias(x, w, b, out_dtype=jnp.float32):
    """(M, K) @ (K, N) + (1, N) -> (M, N).  N must be a multiple of 128
    (lane-dense output).  M is zero-padded up to the row tile (no degenerate
    8-row or full-M fallback tiles)."""
    M, K = x.shape
    K2, N = w.shape
    assert K == K2 and N % LANE == 0

    tm = 256 if M >= 256 else _round_up(M, 8)
    Mp = _round_up(M, tm)
    if Mp != M:
        x = jnp.pad(x, ((0, Mp - M), (0, 0)))

    if N <= 512:
        tn = N
    elif N % 512 == 0:
        tn = 512
    elif N % 256 == 0:
        tn = 256
    else:
        tn = 128

    out_itemsize = np.dtype(out_dtype).itemsize
    block_bytes = (tm * K * x.dtype.itemsize + K * tn * w.dtype.itemsize
                   + 8 * tn * b.dtype.itemsize + tm * tn * out_itemsize)

    out = pl.pallas_call(
        _matmul_bias_kernel,
        out_shape=jax.ShapeDtypeStruct((Mp, N), out_dtype),
        grid=(Mp // tm, N // tn),
        in_specs=[pl.BlockSpec((tm, K), lambda i, j: (i, 0)),
                  pl.BlockSpec((K, tn), lambda i, j: (0, j)),
                  pl.BlockSpec((1, tn), lambda i, j: (0, j))],
        out_specs=pl.BlockSpec((tm, tn), lambda i, j: (i, j)),
        compiler_params=_mosaic_params(("parallel", "parallel"), block_bytes),
    )(x, w, b)
    return out[:M] if Mp != M else out


# ---------------------------------------------------------------------------
# GRU recurrence kernel: one grid step per (batch-chunk, time-step).
# Only the hidden-side matmul (bc, Hp) x (Hp, 3Hp) and the gate math sit on
# the serial dependency chain; GI in / H_all out are pipelined by BlockSpecs.
# Gate blocks are padded to Hp = multiple of 128 lanes (vreg-aligned slices).
# b_hh for the r/z gates is pre-folded into GI; only the n-gate hidden bias
# remains (it must stay inside r*( . ) per GRU semantics).
# ---------------------------------------------------------------------------
def _gru_step_kernel(gi_ref,    # (bc, 3Hp) bf16  precomputed input gates (this t)
                     ctxg_ref,  # (bc, 3Hp) f32   constant context gates
                     h0_ref,    # (bc, Hp)  f32   initial hidden state
                     whh_ref,   # (Hp, 3Hp) f32   W_hh^T, gate-padded
                     bhhn_ref,  # (1, Hp)   f32   n-gate hidden bias
                     hall_ref,  # out (bc, Hp) bf16  hidden state for this t
                     hfin_ref,  # out (bc, Hp) f32   final hidden state
                     h_scr):    # scratch (bc, Hp) f32  carried hidden state
    t = pl.program_id(1)
    Hp = h0_ref.shape[-1]

    @pl.when(t == 0)
    def _():
        h_scr[...] = h0_ref[...]

    h = h_scr[...]
    gi = gi_ref[...].astype(jnp.float32) + ctxg_ref[...]
    gh = jnp.dot(h, whh_ref[...], preferred_element_type=jnp.float32)

    r = jax.nn.sigmoid(gi[:, 0:Hp] + gh[:, 0:Hp])
    z = jax.nn.sigmoid(gi[:, Hp:2 * Hp] + gh[:, Hp:2 * Hp])
    n = jnp.tanh(gi[:, 2 * Hp:3 * Hp] + r * (gh[:, 2 * Hp:3 * Hp] + bhhn_ref[...]))
    h_new = (1.0 - z) * n + z * h

    h_scr[...] = h_new
    hall_ref[...] = h_new.astype(hall_ref.dtype)

    @pl.when(t == pl.num_programs(1) - 1)
    def _():
        hfin_ref[...] = h_new


def _batch_chunk(B):
    # v7x has 2 TensorCores: split the batch-parallel axis into two >=8-row,
    # 8-aligned chunks when possible.  No effect on 1-TC chips (v5e/v6e).
    if B % 16 == 0:
        return B // 2
    return B


# ---------------------------------------------------------------------------
# One-time weight packing (outside the jitted forward): transpose, split
# gates, pad every gate block / the vocab axis to 128-lane multiples, fold
# the r/z hidden biases into the input bias, cast MXU operands to bf16.
# ---------------------------------------------------------------------------
def _split_pad_gates(w, Hp):
    """(3H, K) gate-stacked PyTorch weight -> (K, 3*Hp): transposed, each gate
    block lane-padded to Hp with zeros."""
    three_h, K = w.shape
    H = three_h // 3
    wt = jnp.transpose(w.reshape(3, H, K), (2, 0, 1))        # (K, 3, H)
    wt = jnp.pad(wt, ((0, 0), (0, 0), (0, Hp - H)))          # (K, 3, Hp)
    return wt.reshape(K, 3 * Hp)


def pack_decoder_params(params):
    w_emb = params["w_emb"]            # (V, E)
    w_ih = params["w_ih"]              # (3H, E+H)  [r|z|n] rows, [emb|ctx] cols
    w_hh = params["w_hh"]              # (3H, H)
    b_ih = params["b_ih"]              # (3H,)
    b_hh = params["b_hh"]              # (3H,)
    w_out = params["w_out"]            # (V, H)
    b_out = params["b_out"]            # (V,)

    V, E = w_emb.shape
    H = w_hh.shape[1]
    Hp = _round_up(H, LANE)
    Vp = _round_up(V, LANE)

    b_ih3 = b_ih.reshape(3, H)
    b_hh3 = b_hh.reshape(3, H)
    # Fold b_hh for the r/z gates into the input bias (added once in GI);
    # the n-gate hidden bias must stay on the gh side (inside r*(...)).
    b_fold = jnp.stack([b_ih3[0] + b_hh3[0], b_ih3[1] + b_hh3[1], b_ih3[2]], 0)

    packed = {
        "w_emb": w_emb.astype(jnp.bfloat16),
        "wie_p": _split_pad_gates(w_ih[:, :E], Hp).astype(jnp.bfloat16),       # (E, 3Hp)
        "wic_p": _split_pad_gates(w_ih[:, E:], Hp),                            # (H, 3Hp) f32
        "whh_p": jnp.pad(_split_pad_gates(w_hh, Hp), ((0, Hp - H), (0, 0))),   # (Hp, 3Hp) f32
        "bih_p": jnp.pad(b_fold, ((0, 0), (0, Hp - H))).reshape(1, 3 * Hp),    # (1, 3Hp) f32
        "bhhn_p": jnp.pad(b_hh3[2], (0, Hp - H)).reshape(1, Hp),               # (1, Hp) f32
        "wout_p": jnp.pad(w_out.T, ((0, Hp - H), (0, Vp - V))).astype(jnp.bfloat16),  # (Hp, Vp)
        "bout_p": jnp.pad(b_out, (0, Vp - V)).reshape(1, Vp),                  # (1, Vp) f32
    }
    dims = (int(E), int(H), int(V), int(Hp), int(Vp))
    return packed, dims


# ---------------------------------------------------------------------------
# Forward pass (Seq2SeqDecoder.forward semantics).
# ---------------------------------------------------------------------------
@functools.partial(jax.jit, static_argnames=("dims",))
def decoder_forward(X, state, packed, dims):
    """X: (B, T) int32 token ids; state: (1, B, H) float32.
    Returns (logits (B, T, V) f32, new_state (1, B, H) f32)."""
    E, H, V, Hp, Vp = dims
    B, T = X.shape

    # ---- glue: time-major embedding gather (no transpose copy), bf16 ----
    emb2d = jnp.take(packed["w_emb"], X.T, axis=0).reshape(T * B, E)  # (T*B, E)

    # ---- phase 1: hoisted input-side gates (bf16 MXU, bf16 storage) ----
    gi = _matmul_bias(emb2d, packed["wie_p"], packed["bih_p"],
                      out_dtype=jnp.bfloat16).reshape(T, B, 3 * Hp)

    # Context is constant over T: single (B, 3Hp) contribution, computed once.
    ctxg = jnp.dot(state[-1], packed["wic_p"],
                   precision=lax.Precision.HIGHEST)                   # (B, 3Hp) f32

    h0_p = jnp.pad(state[0], ((0, 0), (0, Hp - H)))                   # (B, Hp) f32

    # ---- phase 2: serial GRU recurrence, pipelined grid=(batch_chunks, T) ----
    bchunk = _batch_chunk(B)
    nb = B // bchunk
    blk = max(bchunk, 8)
    rec_block_bytes = (blk * 3 * Hp * (2 + 4) + blk * Hp * (4 + 2 + 4 + 4)
                       + Hp * 3 * Hp * 4 + 8 * Hp * 4)

    hall, hfin = pl.pallas_call(
        _gru_step_kernel,
        out_shape=(jax.ShapeDtypeStruct((T, B, Hp), jnp.bfloat16),
                   jax.ShapeDtypeStruct((B, Hp), jnp.float32)),
        grid=(nb, T),
        in_specs=[
            pl.BlockSpec((pl.Squeezed(), bchunk, 3 * Hp), lambda b, t: (t, b, 0)),
            pl.BlockSpec((bchunk, 3 * Hp), lambda b, t: (b, 0)),
            pl.BlockSpec((bchunk, Hp), lambda b, t: (b, 0)),
            pl.BlockSpec((Hp, 3 * Hp), lambda b, t: (0, 0)),
            pl.BlockSpec((1, Hp), lambda b, t: (0, 0)),
        ],
        out_specs=(
            pl.BlockSpec((pl.Squeezed(), bchunk, Hp), lambda b, t: (t, b, 0)),
            pl.BlockSpec((bchunk, Hp), lambda b, t: (b, 0)),
        ),
        scratch_shapes=[pltpu.VMEM((bchunk, Hp), jnp.float32)],
        compiler_params=_mosaic_params(("parallel", "arbitrary"),
                                       rec_block_bytes),
    )(gi, ctxg, h0_p, packed["whh_p"], packed["bhhn_p"])

    # ---- phase 3: vocab projection, batch-major, lane-dense ----
    # Transpose the small bf16 H_all (not the large f32 logits) so the
    # projection output lands directly in (B, T, Vp) layout.
    hall_bt = jnp.transpose(hall, (1, 0, 2)).reshape(B * T, Hp)       # bf16
    logits2d = _matmul_bias(hall_bt, packed["wout_p"], packed["bout_p"],
                            out_dtype=jnp.float32)                    # (B*T, Vp)

    logits = logits2d.reshape(B, T, Vp)[:, :, :V]                     # (B, T, V)
    new_state = hfin[:, :H][None]                                     # (1, B, H)
    return logits, new_state


# ---------------------------------------------------------------------------
# Pure-JAX f32 reference (for correctness check).
# ---------------------------------------------------------------------------
def _reference_forward(X, state, params):
    w_emb, w_ih, w_hh = params["w_emb"], params["w_ih"], params["w_hh"]
    b_ih, b_hh, w_out, b_out = (params["b_ih"], params["b_hh"],
                                params["w_out"], params["b_out"])
    B, T = X.shape
    H = w_hh.shape[1]
    emb = jnp.take(w_emb, X, axis=0).transpose(1, 0, 2)              # (T, B, E)
    context = jnp.broadcast_to(state[-1], (T, B, H))
    xc = jnp.concatenate([emb, context], axis=2)

    def step(h, x_t):
        gi = x_t @ w_ih.T + b_ih
        gh = h @ w_hh.T + b_hh
        i_r, i_z, i_n = jnp.split(gi, 3, axis=-1)
        h_r, h_z, h_n = jnp.split(gh, 3, axis=-1)
        r = jax.nn.sigmoid(i_r + h_r)
        z = jax.nn.sigmoid(i_z + h_z)
        n = jnp.tanh(i_n + r * h_n)
        h_new = (1.0 - z) * n + z * h
        return h_new, h_new

    h_fin, outs = lax.scan(step, state[0], xc)
    logits = outs @ w_out.T + b_out
    return jnp.transpose(logits, (1, 0, 2)), h_fin[None]


def init_params(key, vocab_size, embed_size, num_hiddens):
    ks = jax.random.split(key, 7)
    s = 0.1
    return {
        "w_emb": s * jax.random.normal(ks[0], (vocab_size, embed_size), jnp.float32),
        "w_ih": s * jax.random.normal(ks[1], (3 * num_hiddens, embed_size + num_hiddens), jnp.float32),
        "w_hh": s * jax.random.normal(ks[2], (3 * num_hiddens, num_hiddens), jnp.float32),
        "b_ih": s * jax.random.normal(ks[3], (3 * num_hiddens,), jnp.float32),
        "b_hh": s * jax.random.normal(ks[4], (3 * num_hiddens,), jnp.float32),
        "w_out": s * jax.random.normal(ks[5], (vocab_size, num_hiddens), jnp.float32),
        "b_out": s * jax.random.normal(ks[6], (vocab_size,), jnp.float32),
    }


if __name__ == "__main__":
    vocab_size, embed_size, num_hiddens = 32, 16, 32
    batch, num_steps = 2, 8

    key = jax.random.PRNGKey(0)
    k_par, k_x, k_h = jax.random.split(key, 3)

    params = init_params(k_par, vocab_size, embed_size, num_hiddens)
    X = jax.random.randint(k_x, (batch, num_steps), 0, vocab_size, dtype=jnp.int32)
    # init_state(enc_outputs)[1] stand-in: the encoder's final hidden state.
    state = 0.1 * jax.random.normal(k_h, (1, batch, num_hiddens), jnp.float32)

    packed, dims = pack_decoder_params(params)   # one-time weight packing

    logits, new_state = decoder_forward(X, state, packed, dims)
    jax.block_until_ready((logits, new_state))

    ref_logits, ref_state = _reference_forward(X, state, params)
    # bf16 MXU operands / bf16 GI & H_all storage -> compare at bf16 tolerance.
    np.testing.assert_allclose(np.asarray(logits), np.asarray(ref_logits),
                               rtol=2e-2, atol=2e-2)
    np.testing.assert_allclose(np.asarray(new_state), np.asarray(ref_state),
                               rtol=2e-2, atol=2e-2)

    assert logits.shape == (batch, num_steps, vocab_size)
    assert new_state.shape == (1, batch, num_hiddens)
    print("KERNEL_OK")
</pallas_src>

<mosaic_0001>
module attributes {stable_mosaic.version = 11 : i64} {
  func.func @_matmul_bias_kernel(%arg0: i32, %arg1: i32, %arg2: memref<16x16xbf16, #tpu.memory_space<vmem>>, %arg3: memref<16x384xbf16, #tpu.memory_space<vmem>>, %arg4: memref<1x384xf32, #tpu.memory_space<vmem>>, %arg5: memref<16x384xbf16, #tpu.memory_space<vmem>>) attributes {dimension_semantics = [#tpu.dimension_semantics<parallel>, #tpu.dimension_semantics<parallel>], iteration_bounds = array<i64: 1, 1>, scalar_prefetch = 0 : i64, scratch_operands = 0 : i64, tpu.core_type = #tpu.core_type<tc>, window_params = [{transform_indices = @transform_0, window_bounds = array<i64: 16, 16>}, {transform_indices = @transform_1, window_bounds = array<i64: 16, 384>}, {transform_indices = @transform_2, window_bounds = array<i64: 1, 384>}, {transform_indices = @transform_3, window_bounds = array<i64: 16, 384>}]} {
    %c0 = arith.constant 0 : index
    %c0_0 = arith.constant 0 : index
    %0 = vector.load %arg2[%c0, %c0_0] : memref<16x16xbf16, #tpu.memory_space<vmem>>, vector<16x16xbf16>
    %c0_1 = arith.constant 0 : index
    %c0_2 = arith.constant 0 : index
    %1 = vector.load %arg3[%c0_1, %c0_2] : memref<16x384xbf16, #tpu.memory_space<vmem>>, vector<16x384xbf16>
    %cst = arith.constant dense<0.000000e+00> : vector<16x384xf32>
    %2 = tpu.matmul %0, %1, %cst {dimension_numbers = #tpu.dot_dimension_numbers<[1], [0], [0], [1], [0, 0, 1, 1], [], []>} : vector<16x16xbf16>, vector<16x384xbf16>, vector<16x384xf32> -> vector<16x384xf32>
    %c0_3 = arith.constant 0 : index
    %c0_4 = arith.constant 0 : index
    %3 = vector.load %arg4[%c0_3, %c0_4] : memref<1x384xf32, #tpu.memory_space<vmem>>, vector<1x384xf32>
    %4 = vector.broadcast %3 : vector<1x384xf32> to vector<16x384xf32>
    %5 = arith.addf %2, %4 : vector<16x384xf32>
    %6 = arith.truncf %5 : vector<16x384xf32> to vector<16x384xbf16>
    %c0_5 = arith.constant 0 : index
    %c0_6 = arith.constant 0 : index
    %7 = vector.load %arg5[%c0_5, %c0_6] : memref<16x384xbf16, #tpu.memory_space<vmem>>, vector<16x384xbf16>
    tpu.vector_store %arg5[%c0_5, %c0_6], %6 {strides = array<i32>} : memref<16x384xbf16, #tpu.memory_space<vmem>>, vector<16x384xbf16>,
    return
  }
  func.func @transform_0(%arg0: i32, %arg1: i32) -> (i32, i32) {
    %c0_i32 = arith.constant 0 : i32
    %c0_i32_0 = arith.constant 0 : i32
    return %arg0, %c0_i32 : i32, i32
  }
  func.func @transform_1(%arg0: i32, %arg1: i32) -> (i32, i32) {
    %c0_i32 = arith.constant 0 : i32
    %c0_i32_0 = arith.constant 0 : i32
    return %c0_i32, %arg1 : i32, i32
  }
  func.func @transform_2(%arg0: i32, %arg1: i32) -> (i32, i32) {
    %c0_i32 = arith.constant 0 : i32
    %c0_i32_0 = arith.constant 0 : i32
    return %c0_i32, %arg1 : i32, i32
  }
  func.func @transform_3(%arg0: i32, %arg1: i32) -> (i32, i32) {
    %c0_i32 = arith.constant 0 : i32
    return %arg0, %arg1 : i32, i32
  }
}

module attributes {stable_mosaic.version = 11 : i64} {
  func.func @_gru_step_kernel(%arg0: i32, %arg1: i32, %arg2: memref<1x2x384xbf16, #tpu.memory_space<vmem>>, %arg3: memref<2x384xf32, #tpu.memory_space<vmem>>, %arg4: memref<2x128xf32, #tpu.memory_space<vmem>>, %arg5: memref<128x384xf32, #tpu.memory_space<vmem>>, %arg6: memref<1x128xf32, #tpu.memory_space<vmem>>, %arg7: memref<1x2x128xbf16, #tpu.memory_space<vmem>>, %arg8: memref<2x128xf32, #tpu.memory_space<vmem>>, %arg9: memref<2x128xf32, #tpu.memory_space<vmem>>) attributes {dimension_semantics = [#tpu.dimension_semantics<parallel>, #tpu.dimension_semantics<arbitrary>], iteration_bounds = array<i64: 1, 8>, scalar_prefetch = 0 : i64, scratch_operands = 1 : i64, tpu.core_type = #tpu.core_type<tc>, window_params = [{transform_indices = @transform_0, window_bounds = array<i64: 1, 2, 384>}, {transform_indices = @transform_1, window_bounds = array<i64: 2, 384>}, {transform_indices = @transform_2, window_bounds = array<i64: 2, 128>}, {pipeline_mode = #tpu.pipeline_mode<synchronous>, transform_indices = @transform_3, window_bounds = array<i64: 128, 384>}, {pipeline_mode = #tpu.pipeline_mode<synchronous>, transform_indices = @transform_4, window_bounds = array<i64: 1, 128>}, {transform_indices = @transform_5, window_bounds = array<i64: 1, 2, 128>}, {transform_indices = @transform_6, window_bounds = array<i64: 2, 128>}]} {
    %c0_i32 = arith.constant 0 : i32
    %0 = arith.cmpi eq, %arg1, %c0_i32 : i32
    %1 = arith.extui %0 : i1 to i32
    %c0_i32_0 = arith.constant 0 : i32
    %2 = arith.cmpi ne, %1, %c0_i32_0 : i32
    scf.if %2 {
      %c0_20 = arith.constant 0 : index
      %c0_21 = arith.constant 0 : index
      %48 = vector.load %arg4[%c0_20, %c0_21] : memref<2x128xf32, #tpu.memory_space<vmem>>, vector<2x128xf32>
      %c0_22 = arith.constant 0 : index
      %c0_23 = arith.constant 0 : index
      %49 = vector.load %arg9[%c0_22, %c0_23] : memref<2x128xf32, #tpu.memory_space<vmem>>, vector<2x128xf32>
      tpu.vector_store %arg9[%c0_22, %c0_23], %48 {strides = array<i32>} : memref<2x128xf32, #tpu.memory_space<vmem>>, vector<2x128xf32>,
    } else {
    }
    %c0 = arith.constant 0 : index
    %c0_1 = arith.constant 0 : index
    %3 = vector.load %arg9[%c0, %c0_1] : memref<2x128xf32, #tpu.memory_space<vmem>>, vector<2x128xf32>
    %c0_2 = arith.constant 0 : index
    %c0_3 = arith.constant 0 : index
    %c0_4 = arith.constant 0 : index
    %4 = vector.load %arg2[%c0_2, %c0_3, %c0_4] : memref<1x2x384xbf16, #tpu.memory_space<vmem>>, vector<1x2x384xbf16>
    %5 = vector.shape_cast %4 : vector<1x2x384xbf16> to vector<2x384xbf16>
    %6 = arith.extf %5 : vector<2x384xbf16> to vector<2x384xf32>
    %c0_5 = arith.constant 0 : index
    %c0_6 = arith.constant 0 : index
    %7 = vector.load %arg3[%c0_5, %c0_6] : memref<2x384xf32, #tpu.memory_space<vmem>>, vector<2x384xf32>
    %8 = arith.addf %6, %7 : vector<2x384xf32>
    %c0_7 = arith.constant 0 : index
    %c0_8 = arith.constant 0 : index
    %9 = vector.load %arg5[%c0_7, %c0_8] : memref<128x384xf32, #tpu.memory_space<vmem>>, vector<128x384xf32>
    %cst = arith.constant dense<0.000000e+00> : vector<2x384xf32>
    %10 = tpu.matmul %3, %9, %cst {dimension_numbers = #tpu.dot_dimension_numbers<[1], [0], [0], [1], [0, 0, 1, 1], [], []>} : vector<2x128xf32>, vector<128x384xf32>, vector<2x384xf32> -> vector<2x384xf32>
    %11 = vector.extract_strided_slice %8 {offsets = [0, 0], sizes = [2, 128], strides = [1, 1]} : vector<2x384xf32> to vector<2x128xf32>
    %12 = vector.extract_strided_slice %10 {offsets = [0, 0], sizes = [2, 128], strides = [1, 1]} : vector<2x384xf32> to vector<2x128xf32>
    %13 = arith.addf %11, %12 : vector<2x128xf32>
    %14 = arith.negf %13 : vector<2x128xf32>
    %15 = math.exp %14 : vector<2x128xf32>
    %cst_9 = arith.constant 1.000000e+00 : f32
    %16 = vector.broadcast %cst_9 : f32 to vector<2x128xf32>
    %17 = arith.addf %16, %15 : vector<2x128xf32>
    %18 = arith.divf %16, %17 : vector<2x128xf32>
    %19 = vector.extract_strided_slice %8 {offsets = [0, 128], sizes = [2, 128], strides = [1, 1]} : vector<2x384xf32> to vector<2x128xf32>
    %20 = vector.extract_strided_slice %10 {offsets = [0, 128], sizes = [2, 128], strides = [1, 1]} : vector<2x384xf32> to vector<2x128xf32>
    %21 = arith.addf %19, %20 : vector<2x128xf32>
    %22 = arith.negf %21 : vector<2x128xf32>
    %23 = math.exp %22 : vector<2x128xf32>
    %cst_10 = arith.constant 1.000000e+00 : f32
    %24 = vector.broadcast %cst_10 : f32 to vector<2x128xf32>
    %25 = arith.addf %24, %23 : vector<2x128xf32>
    %26 = arith.divf %24, %25 : vector<2x128xf32>
    %27 = vector.extract_strided_slice %8 {offsets = [0, 256], sizes = [2, 128], strides = [1, 1]} : vector<2x384xf32> to vector<2x128xf32>
    %28 = vector.extract_strided_slice %10 {offsets = [0, 256], sizes = [2, 128], strides = [1, 1]} : vector<2x384xf32> to vector<2x128xf32>
    %c0_11 = arith.constant 0 : index
    %c0_12 = arith.constant 0 : index
    %29 = vector.load %arg6[%c0_11, %c0_12] : memref<1x128xf32, #tpu.memory_space<vmem>>, vector<1x128xf32>
    %30 = vector.broadcast %29 : vector<1x128xf32> to vector<2x128xf32>
    %31 = arith.addf %28, %30 : vector<2x128xf32>
    %32 = arith.mulf %18, %31 : vector<2x128xf32>
    %33 = arith.addf %27, %32 : vector<2x128xf32>
    %34 = math.tanh %33 : vector<2x128xf32>
    %cst_13 = arith.constant 1.000000e+00 : f32
    %35 = vector.broadcast %cst_13 : f32 to vector<2x128xf32>
    %36 = arith.subf %35, %26 : vector<2x128xf32>
    %37 = arith.mulf %36, %34 : vector<2x128xf32>
    %38 = arith.mulf %26, %3 : vector<2x128xf32>
    %39 = arith.addf %37, %38 : vector<2x128xf32>
    %c0_14 = arith.constant 0 : index
    %c0_15 = arith.constant 0 : index
    %40 = vector.load %arg9[%c0_14, %c0_15] : memref<2x128xf32, #tpu.memory_space<vmem>>, vector<2x128xf32>
    tpu.vector_store %arg9[%c0_14, %c0_15], %39 {strides = array<i32>} : memref<2x128xf32, #tpu.memory_space<vmem>>, vector<2x128xf32>,
    %41 = arith.truncf %39 : vector<2x128xf32> to vector<2x128xbf16>
    %c0_16 = arith.constant 0 : index
    %c0_17 = arith.constant 0 : index
    %c0_18 = arith.constant 0 : index
    %42 = vector.load %arg7[%c0_16, %c0_17, %c0_18] : memref<1x2x128xbf16, #tpu.memory_space<vmem>>, vector<1x2x128xbf16>
    %43 = vector.shape_cast %42 : vector<1x2x128xbf16> to vector<2x128xbf16>
    %44 = vector.shape_cast %41 : vector<2x128xbf16> to vector<1x2x128xbf16>
    tpu.vector_store %arg7[%c0_16, %c0_17, %c0_18], %44 {strides = array<i32>} : memref<1x2x128xbf16, #tpu.memory_space<vmem>>, vector<1x2x128xbf16>,
    %c7_i32 = arith.constant 7 : i32
    %45 = arith.cmpi eq, %arg1, %c7_i32 : i32
    %46 = arith.extui %45 : i1 to i32
    %c0_i32_19 = arith.constant 0 : i32
    %47 = arith.cmpi ne, %46, %c0_i32_19 : i32
    scf.if %47 {
      %c0_20 = arith.constant 0 : index
      %c0_21 = arith.constant 0 : index
      %48 = vector.load %arg8[%c0_20, %c0_21] : memref<2x128xf32, #tpu.memory_space<vmem>>, vector<2x128xf32>
      tpu.vector_store %arg8[%c0_20, %c0_21], %39 {strides = array<i32>} : memref<2x128xf32, #tpu.memory_space<vmem>>, vector<2x128xf32>,
    } else {
    }
    return
  }
  func.func @transform_0(%arg0: i32, %arg1: i32) -> (i32, i32, i32) {
    %c0_i32 = arith.constant 0 : i32
    %c0_i32_0 = arith.constant 0 : i32
    return %arg1, %arg0, %c0_i32 : i32, i32, i32
  }
  func.func @transform_1(%arg0: i32, %arg1: i32) -> (i32, i32) {
    %c0_i32 = arith.constant 0 : i32
    %c0_i32_0 = arith.constant 0 : i32
    return %arg0, %c0_i32 : i32, i32
  }
  func.func @transform_2(%arg0: i32, %arg1: i32) -> (i32, i32) {
    %c0_i32 = arith.constant 0 : i32
    %c0_i32_0 = arith.constant 0 : i32
    return %arg0, %c0_i32 : i32, i32
  }
  func.func @transform_3(%arg0: i32, %arg1: i32) -> (i32, i32) {
    %c0_i32 = arith.constant 0 : i32
    %c0_i32_0 = arith.constant 0 : i32
    %c0_i32_1 = arith.constant 0 : i32
    return %c0_i32, %c0_i32_0 : i32, i32
  }
  func.func @transform_4(%arg0: i32, %arg1: i32) -> (i32, i32) {
    %c0_i32 = arith.constant 0 : i32
    %c0_i32_0 = arith.constant 0 : i32
    %c0_i32_1 = arith.constant 0 : i32
    return %c0_i32, %c0_i32_0 : i32, i32
  }
  func.func @transform_5(%arg0: i32, %arg1: i32) -> (i32, i32, i32) {
    %c0_i32 = arith.constant 0 : i32
    %c0_i32_0 = arith.constant 0 : i32
    return %arg1, %arg0, %c0_i32 : i32, i32, i32
  }
  func.func @transform_6(%arg0: i32, %arg1: i32) -> (i32, i32) {
    %c0_i32 = arith.constant 0 : i32
    %c0_i32_0 = arith.constant 0 : i32
    return %arg0, %c0_i32 : i32, i32
  }
}

module attributes {stable_mosaic.version = 11 : i64} {
  func.func @_matmul_bias_kernel(%arg0: i32, %arg1: i32, %arg2: memref<16x128xbf16, #tpu.memory_space<vmem>>, %arg3: memref<128x128xbf16, #tpu.memory_space<vmem>>, %arg4: memref<1x128xf32, #tpu.memory_space<vmem>>, %arg5: memref<16x128xf32, #tpu.memory_space<vmem>>) attributes {dimension_semantics = [#tpu.dimension_semantics<parallel>, #tpu.dimension_semantics<parallel>], iteration_bounds = array<i64: 1, 1>, scalar_prefetch = 0 : i64, scratch_operands = 0 : i64, tpu.core_type = #tpu.core_type<tc>, window_params = [{transform_indices = @transform_0, window_bounds = array<i64: 16, 128>}, {transform_indices = @transform_1, window_bounds = array<i64: 128, 128>}, {transform_indices = @transform_2, window_bounds = array<i64: 1, 128>}, {transform_indices = @transform_3, window_bounds = array<i64: 16, 128>}]} {
    %c0 = arith.constant 0 : index
    %c0_0 = arith.constant 0 : index
    %0 = vector.load %arg2[%c0, %c0_0] : memref<16x128xbf16, #tpu.memory_space<vmem>>, vector<16x128xbf16>
    %c0_1 = arith.constant 0 : index
    %c0_2 = arith.constant 0 : index
    %1 = vector.load %arg3[%c0_1, %c0_2] : memref<128x128xbf16, #tpu.memory_space<vmem>>, vector<128x128xbf16>
    %cst = arith.constant dense<0.000000e+00> : vector<16x128xf32>
    %2 = tpu.matmul %0, %1, %cst {dimension_numbers = #tpu.dot_dimension_numbers<[1], [0], [0], [1], [0, 0, 1, 1], [], []>} : vector<16x128xbf16>, vector<128x128xbf16>, vector<16x128xf32> -> vector<16x128xf32>
    %c0_3 = arith.constant 0 : index
    %c0_4 = arith.constant 0 : index
    %3 = vector.load %arg4[%c0_3, %c0_4] : memref<1x128xf32, #tpu.memory_space<vmem>>, vector<1x128xf32>
    %4 = vector.broadcast %3 : vector<1x128xf32> to vector<16x128xf32>
    %5 = arith.addf %2, %4 : vector<16x128xf32>
    %c0_5 = arith.constant 0 : index
    %c0_6 = arith.constant 0 : index
    %6 = vector.load %arg5[%c0_5, %c0_6] : memref<16x128xf32, #tpu.memory_space<vmem>>, vector<16x128xf32>
    tpu.vector_store %arg5[%c0_5, %c0_6], %5 {strides = array<i32>} : memref<16x128xf32, #tpu.memory_space<vmem>>, vector<16x128xf32>,
    return
  }
  func.func @transform_0(%arg0: i32, %arg1: i32) -> (i32, i32) {
    %c0_i32 = arith.constant 0 : i32
    %c0_i32_0 = arith.constant 0 : i32
    return %arg0, %c0_i32 : i32, i32
  }
  func.func @transform_1(%arg0: i32, %arg1: i32) -> (i32, i32) {
    %c0_i32 = arith.constant 0 : i32
    %c0_i32_0 = arith.constant 0 : i32
    return %c0_i32, %arg1 : i32, i32
  }
  func.func @transform_2(%arg0: i32, %arg1: i32) -> (i32, i32) {
    %c0_i32 = arith.constant 0 : i32
    %c0_i32_0 = arith.constant 0 : i32
    return %c0_i32, %arg1 : i32, i32
  }
  func.func @transform_3(%arg0: i32, %arg1: i32) -> (i32, i32) {
    %c0_i32 = arith.constant 0 : i32
    return %arg0, %arg1 : i32, i32
  }
}

</mosaic_0001>

<bundles_post_ra>
// kernel: decoder_forward.3
= control target key start
LH: loop header
LB: loop body
LE: loop exit
PB: predicated region body
PF: predicated region fallthrough
CT: control target
= control target key end

     0   :  { %v205_v0 = vmov 0.0   ;;  %vm206_vm0 = vmmov 0   ;;  %v207_v3 = vmov 0   ;;  %vm59_vm1 = vcmask 130048   ;;  %s255_s1 = inlined_call_operand.vmem [shape: bf16[16,384], index: 1, kind: input, shape index: {}]   ;;  %s256_s0 = inlined_call_operand.vmem [shape: bf16[16,16], index: 0, kind: input, shape index: {}]   ;;  %s257_s2 = inlined_call_operand.vmem [shape: f32[1,384], index: 2, kind: input, shape index: {}]   ;;  %s258_s3 = inlined_call_operand.vmem [shape: bf16[16,384], index: 3, kind: output, shape index: {}]  }
   0x1   :  { %191 = vmatprep.subr.bf16.mxu1 %v205_v0  ;;  %v200_v1 = vld [vmem:[%s255_s1 + $0x4] ss:$12 sps:$4 sm:$0xff]   ;;  %193 = vmatprep.mubr.msk.bf16.mxu1 %vm206_vm0, %v205_v0  ;;  %v202_v2 = vld [vmem:[%s255_s1 + $0x8] ss:$12 sps:$4 sm:$0xff]   ;;  %v203_v4 = vld [vmem:[%s255_s1] ss:$12 sps:$4 sm:$0xff]   ;;  %v23_v6 = vlaneseq }
   0x2   :  { %95 = vmatprep.mubr.bf16.mxu0 %v207_v3  ;;  %77 = vmatprep.subr.bf16.mxu0 %v200_v1  ;;  %v204_v5 = vld [vmem:[%s256_s0] sm:$0xff]  }
   0x3   :  { %192 = vmatpush3.bf16.msra.mxu1 %v202_v2  ;;  %78 = vmatpush1.bf16.msra.mxu0 %v203_v4  ;;  %v24_v7 = vshrl.u32 %v23_v6, 7  ;;  %v21_v9 = vld [vmem:[%s257_s2] sm:$0x7] }
   0x5   :  { %v33_v8 = vsub.s32 2, %v24_v7  ;;  %v25_v10 = vsub.s32 0, %v24_v7  ;;  %v29_v11 = vsub.s32 1, %v24_v7 }
   0x6   :  { %194 = vmatmul.mubr.msk.bf16.vlgmr.msra.gmra.mxu1 %vm59_vm1, %v204_v5  ;;  %179 = vmatmul.mubr.msk.bf16.vlgmr.msra.gmra.mxu0 %vm59_vm1, %v204_v5 }
   0x7   :  { %v34_v12 = vrot.slane %v21_v9, %v33_v8  ;;  %v26_v14 = vrot.slane %v21_v9, %v25_v10  ;;  %v30_v15 = vrot.slane %v21_v9, %v29_v11 }
  0xc6   :  { %v140_v13 = vpop.f32.mrf.mxu1  ;;  %v97_v17 = vpop.f32.mrf.mxu0 }
  0xc7   :  { %v141_v16 = vadd.f32 %v140_v13, %v34_v12  ;;  %v98_v21 = vadd.f32 %v97_v17, %v26_v14 }
  0xc8   :  { %v195_v18 = vpop.f32.mrf.mxu1  ;;  %v99_v20 = vpop.f32.mrf.mxu0 }
  0xc9   :  { %v186_v19 = vpack.c.bf16 %v141_v16, %v141_v16  ;;  %v100_v22 = vadd.f32 %v99_v20, %v30_v15 }
  0xca   :  { %v143_v23 = vpop.f32.mrf.mxu1  ;;  %v101_v25 = vpop.f32.mrf.mxu0 }
  0xcb   :  { %168 = vst [vmem:[%s258_s3 + $0x8] sm:$0xf] %v186_v19  ;;  %v144_v24 = vadd.f32 %v143_v23, %v34_v12  ;;  %v185_v26 = vpack.c.bf16 %v100_v22, %v98_v21  ;;  %v102_v30 = vadd.f32 %v101_v25, %v26_v14 }
  0xcc   :  { %v196_v27 = vpop.f32.mrf.mxu1  ;;  %v103_v29 = vpop.f32.mrf.mxu0 }
  0xcd   :  { %v188_v28 = vpack.c.bf16 %v144_v24, %v144_v24  ;;  %167 = vst [vmem:[%s258_s3] sm:$0xff] %v185_v26  ;;  %v104_v31 = vadd.f32 %v103_v29, %v30_v15 }
  0xcf   :  { %170 = vst [vmem:[%s258_s3 + $0x14] sm:$0xf] %v188_v28  ;;  %v187_v32 = vpack.c.bf16 %v104_v31, %v102_v30 }
  0xd1   :  { %169 = vst [vmem:[%s258_s3 + $0xc] sm:$0xff] %v187_v32 }

// kernel: decoder_forward.5
= control target key start
LH: loop header
LB: loop body
LE: loop exit
PB: predicated region body
PF: predicated region fallthrough
CT: control target
= control target key end

     0   :  { %v229_v1 = vmov 0.0   ;;  %vm230_vm0 = vmmov 0   ;;  %s287_s0 = inlined_call_operand.vmem [shape: bf16[16,128], index: 0, kind: input, shape index: {}]   ;;  %s288_s1 = inlined_call_operand.vmem [shape: bf16[128,128], index: 1, kind: input, shape index: {}]   ;;  %s289_s2 = inlined_call_operand.vmem [shape: f32[1,128], index: 2, kind: input, shape index: {}]   ;;  %s290_s3 = inlined_call_operand.hbm [shape: f32[16,128], index: 3, kind: output, shape index: {}]  }
   0x1   :  { %v198_v0 = vld [vmem:[%s288_s1 + $0x38] sm:$0xff]   ;;  %173 = vmatprep.subr.bf16.mxu0 %v229_v1  ;;  %v199_v2 = vld [vmem:[%s288_s1 + $0x30] sm:$0xff]   ;;  %189 = vmatprep.mubr.msk.bf16.mxu0 %vm230_vm0, %v229_v1  ;;  %v200_v3 = vld [vmem:[%s288_s1 + $0x28] sm:$0xff]  }
   0x2   :  { %174 = vmatpush3.bf16.msra.mxu0 %v198_v0 }
   0x3   :  { %175 = vmatprep.subr.bf16.mxu0 %v229_v1 }
   0x6   :  { %176 = vmatpush3.bf16.msra.mxu0 %v199_v2 }
   0x7   :  { %177 = vmatprep.subr.bf16.mxu0 %v229_v1 }
   0x8   :  { %8 = vsyncpa [#allocation3], 0  ;;  %v201_v4 = vld [vmem:[%s288_s1 + $0x20] sm:$0xff]   ;;  %v202_v5 = vld [vmem:[%s288_s1 + $0x18] sm:$0xff]   ;;  %s231_s5 = smov [#allocation2]  }
   0x9   :  { %v203_v6 = vld [vmem:[%s288_s1 + $0x10] sm:$0xff]   ;;  %v204_v7 = vld [vmem:[%s288_s1 + $0x8] sm:$0xff]   ;;  %v205_v8 = vld [vmem:[%s288_s1] sm:$0xff]   ;;  %s143_s6 = sshll.u32 %s231_s5, 4  ;;  %s144_s6 = int_to_ptr.vmem [resolvable:$true] %s143_s6 }
   0xa   :  { %178 = vmatpush3.bf16.msra.mxu0 %v200_v3  ;;  %v206_v9 = vld [vmem:[%s287_s0] sm:$0xff]   ;;  %s207_s1 = scalar_lea.vmem %s144_s6, 256  ;;  %p212_p1 = scmp.lt.s32.totalorder %s144_s6, %s144_s6 }
   0xb   :  { %179 = vmatprep.subr.bf16.mxu0 %v229_v1  ;;  %v154_v10 = vld [vmem:[%s289_s2] ss:$0 sm:$0xff]  ;;  %p208_p0 = scmp.ne.s32.totalorder %s144_s6, %s207_s1  ;;  %p213_p2 = scmp.lt.s32.totalorder %s207_s1, %s207_s1 }
   0xd   :  { %p214_p3 = por %p213_p2, %p212_p1 }
   0xe   :  { %180 = vmatpush3.bf16.msra.mxu0 %v201_v4 }
   0xf   :  { %181 = vmatprep.subr.bf16.mxu0 %v229_v1  ;;  %p215_p4 = pnand %p214_p3, %p208_p0 }
  0x12   :  { %182 = vmatpush3.bf16.msra.mxu0 %v202_v5 }
  0x13   :  { %183 = vmatprep.subr.bf16.mxu0 %v229_v1 }
  0x16   :  { %184 = vmatpush3.bf16.msra.mxu0 %v203_v6 }
  0x17   :  { %185 = vmatprep.subr.bf16.mxu0 %v229_v1 }
  0x1a   :  { %186 = vmatpush3.bf16.msra.mxu0 %v204_v7 }
  0x1b   :  { %187 = vmatprep.subr.bf16.mxu0 %v229_v1 }
  0x1e   :  { %188 = vmatpush3.bf16.msra.mxu0 %v205_v8 }
  0x21   :  { %190 = vmatmul.mubr.bf16.vlgmr.msra.gmra.mxu0 %v206_v9 }
  0xe1   :  { %v129_v11 = vpop.f32.mrf.mxu0 }
  0xe2   :  { %v130_v12 = vadd.f32 %v154_v10, %v129_v11 }
  0xe3   :  { %v191_v13 = vpop.f32.mrf.mxu0 }
  0xe4   :  { %136 = vst [vmem:[#allocation2] sm:$0xff] %v130_v12 }
  0xe5   :  { %v132_v14 = vpop.f32.mrf.mxu0 }
  0xe6   :  { %v133_v15 = vadd.f32 %v154_v10, %v132_v14 }
  0xe7   :  { %v192_v16 = vpop.f32.mrf.mxu0 }
  0xe8   :  { %137 = vst [vmem:[#allocation2 + $0x8] sm:$0xff] %v133_v15 }
  0xe9   :  { %218 = shalt.err (!%p215_p4)
}
  0xea   :  { %s232_s0 = smov 128   ;;  %s233_s2 = smov 8  }
  0xeb   :  { %149 = dma.vmem_to_hbm [thread:$0]  %s144_s6, 256, %s290_s3, [#allocation3], %s232_s0, %s232_s0, %s233_s2  }
  0xec   :  { %227 = dma.done.wait [#allocation3], 256  }
  0xed   :  { %228 = vsyncadd [#allocation3], 4294967040 }
  0xee   :  { %153 = vsyncpa [#allocation3], 1 }

// kernel: decoder_forward.4
= control target key start
LH: loop header
LB: loop body
LE: loop exit
PB: predicated region body
PF: predicated region fallthrough
CT: control target
= control target key end

     0   :  { %12 = vsyncpa [#allocation4], 0  ;;  %s939_s21 = smov 0   ;;  %s941_s22 = smov 0   ;;  %s1042_s0 = inlined_call_operand.vmem [shape: bf16[8,2,384], index: 0, kind: input, shape index: {}]   ;;  %s1043_s1 = inlined_call_operand.vmem [shape: f32[2,384], index: 1, kind: input, shape index: {}]   ;;  %s1044_s2 = inlined_call_operand.vmem [shape: f32[2,128], index: 2, kind: input, shape index: {}]   ;;  %s1045_s3 = inlined_call_operand.hbm [shape: f32[128,384], index: 3, kind: input, shape index: {}]   ;;  %s1046_s4 = inlined_call_operand.vmem [shape: f32[1,128], index: 4, kind: input, shape index: {}]   ;;  %s1047_s5 = inlined_call_operand.vmem [shape: bf16[8,2,128], index: 5, kind: output, shape index: {0}]   ;;  %s1048_s6 = inlined_call_operand.vmem [shape: f32[2,128], index: 6, kind: output, shape index: {1}]  }
   0x1   :  { %s943_s23 = smov 0  }
   0x2 LB: > { %s726_s24 = sadd.s32 4294967295, %s897_s23   ;;  %s27_s25 = sadd.s32 1, %s893_s22  ;;  %s897_s23 = sphi %s943_s23, %s18_s23   ;;  %s893_s22 = sphi %s941_s22, %s1052_s22   ;;  %s889_s21 = sphi %s939_s21, %s1051_s21  }
   0x3   : > { %p28_p0 = scmp.ge.s32.totalorder %s27_s25, 8  ;;  %p728_p1 = scmp.ge.s32.totalorder %s897_s23, 1 }
   0x4   : > { %p211_p2 = scmp.lt.s32.totalorder %s897_s23, 9  ;;  %p964_p4 = scmp.eq.s32.totalorder %s726_s24, 0 }
   0x5   : > { %s1054_s25 = smov (%p28_p0, %s27_s25), 0  ;;  %s899_s28 = smov [#allocation3]  }
   0x6   : > { %p960_p3 = pnand %p728_p1, %p211_p2  ;;  %s238_s29 = sshll.u32 %s899_s28, 4  ;;  %s239_s29 = int_to_ptr.vmem [resolvable:$true] %s238_s29 }
   0x7   : > { %s856_s30 = scalar_lea.vmem %s239_s29, 6144  ;;  %p864_p11 = scmp.lt.s32.totalorder %s239_s29, %s239_s29 }
   0x8   : > { %p800_p5 = pneg %p960_p3  ;;  %p857_p8 = scmp.ne.s32.totalorder %s239_s29, %s856_s30 }
   0x9   : > { %p865_p12 = scmp.lt.s32.totalorder %s856_s30, %s856_s30 }
   0xa   : > { %p801_p6 = pnand %p964_p4, %p800_p5 }
   0xb   : > { %p866_p13 = por %p865_p12, %p864_p11 }
   0xc   : > { %p847_p7 = pneg %p801_p6 }
   0xe   : > { %p859_p9 = pnand %p857_p8, %p847_p7 }
  0x10   : > { %p860_p10 = pneg %p859_p9 }
  0x12   : > { %p867_p0 = pnand %p866_p13, %p860_p10 }
  0x14   : > { %870 = shalt.err (!%p867_p0)
}
  0x15   : > { %s900_s7 = smov 384   ;;  %s901_s8 = smov 24  }
  0x16   : > { %803 = dma.hbm_to_vmem [thread:$0]  (!%p801_p6), %s1045_s3, 6144, %s239_s29, [#allocation4], %s900_s7, %s900_s7, %s901_s8  }
  0x17   : > { %268 = sbr.rel (%p960_p3) target bundleno = 325 (0x145), region = 40 }
  0x1c   : > { %884 = dma.done.wait (%p964_p4), [#allocation4], 6144  }
  0x1d   : > { %886 = vsyncadd (%p964_p4), [#allocation4], 4294961152  ;;  %p315_p1 = scmp.lt.s32.totalorder %s889_s21, 7  ;;  %p735_p2 = scmp.ne.s32.totalorder %s889_s21, 0 }
  0x1f   : > { %s983_s11 = scalar_select %p315_p1, %s889_s21, 7 }
  0x20   : > { %345 = sbr.rel (%p735_p2) target bundleno = 39 (0x27), region = 48 }
  0x21   : > { %s795_s12 = smul.u32 3, %s983_s11  ;;  %s337_s15 = scalar_lea.vmem %s1047_s5, %s983_s11 }
  0x23   : > { %s993_s18 = scalar_lea.vmem %s1042_s0, %s795_s12 }
  0x25   : > { %v346_v0 = vld [vmem:[%s1044_s2] sm:$0x3] }
  0x26   : > { %347 = vst [vmem:[#allocation2] sm:$0x3] %v346_v0 }
  0x27 PF: > { %v399_v1 = vld [vmem:[#allocation3 + $0x170] sm:$0xff]  ;;  %v398_v2 = vld [vmem:[#allocation3 + $0x168] sm:$0xff]  ;;  %v396_v3 = vld [vmem:[#allocation3 + $0x158] sm:$0xff]  ;;  %v902_v5 = vmov 0.0   ;;  %vm903_vm0 = vmmov 0   ;;  %p739_p3 = scmp.ne.s32.totalorder %s889_s21, 7 }
  0x28   : > { %401 = vmatprep.subr.mxu0 %v399_v1  ;;  %v395_v4 = vld [vmem:[#allocation3 + $0x150] sm:$0xff]  ;;  %760 = vmatprep.subr.mxu1 %v902_v5  ;;  %v393_v6 = vld [vmem:[#allocation3 + $0x140] sm:$0xff]  ;;  %v392_v7 = vld [vmem:[#allocation3 + $0x138] sm:$0xff] }
  0x29   : > { %402 = vmatpush1.msra.mxu0 %v398_v2  ;;  %465 = vmatprep.mubr.f32.mxu0 %v902_v5  ;;  %v390_v8 = vld [vmem:[#allocation3 + $0x128] sm:$0xff]  ;;  %v389_v9 = vld [vmem:[#allocation3 + $0x120] sm:$0xff]  ;;  %v387_v10 = vld [vmem:[#allocation3 + $0x110] sm:$0xff] }
  0x2a   : > { %403 = vmatprep.subr.mxu0 %v396_v3  ;;  %792 = vmatprep.mubr.msk.f32.mxu1 %vm903_vm0, %v902_v5  ;;  %v386_v11 = vld [vmem:[#allocation3 + $0x108] sm:$0xff]  ;;  %v384_v12 = vld [vmem:[#allocation3 + $0xf8] sm:$0xff]  ;;  %v383_v13 = vld [vmem:[#allocation3 + $0xf0] sm:$0xff] }
  0x2b   : > { %404 = vmatpush1.msra.mxu0 %v395_v4  ;;  %v381_v14 = vld [vmem:[#allocation3 + $0xe0] sm:$0xff]  ;;  %v400_v15 = vld [vmem:[#allocation3 + $0x178] sm:$0xff]  ;;  %v378_v18 = vld [vmem:[#allocation3 + $0xc8] sm:$0xff] }
  0x2c   : > { %405 = vmatprep.subr.mxu0 %v393_v6  ;;  %v380_v16 = vld [vmem:[#allocation3 + $0xd8] sm:$0xff]  ;;  %761 = vmatpush3.msra.mxu1 %v400_v15  ;;  %v397_v17 = vld [vmem:[#allocation3 + $0x160] sm:$0xff]  ;;  %v394_v19 = vld [vmem:[#allocation3 + $0x148] sm:$0xff] }
  0x2d   : > { %406 = vmatpush1.msra.mxu0 %v392_v7  ;;  %762 = vmatprep.subr.mxu1 %v902_v5  ;;  %v377_v20 = vld [vmem:[#allocation3 + $0xc0] sm:$0xff]  ;;  %v375_v21 = vld [vmem:[#allocation3 + $0xb0] sm:$0xff]  ;;  %v374_v23 = vld [vmem:[#allocation3 + $0xa8] sm:$0xff] }
  0x2e   : > { %407 = vmatprep.subr.mxu0 %v390_v8  ;;  %763 = vmatpush3.msra.mxu1 %v397_v17  ;;  %v391_v22 = vld [vmem:[#allocation3 + $0x130] sm:$0xff]  ;;  %v372_v24 = vld [vmem:[#allocation3 + $0x98] sm:$0xff]  ;;  %v369_v27 = vld [vmem:[#allocation3 + $0x80] sm:$0xff] }
  0x2f   : > { %408 = vmatpush1.msra.mxu0 %v389_v9  ;;  %764 = vmatprep.subr.mxu1 %v902_v5  ;;  %v388_v25 = vld [vmem:[#allocation3 + $0x118] sm:$0xff]  ;;  %v371_v26 = vld [vmem:[#allocation3 + $0x90] sm:$0xff]  ;;  %v385_v28 = vld [vmem:[#allocation3 + $0x100] sm:$0xff] }
  0x30   : > { %409 = vmatprep.subr.mxu0 %v387_v10  ;;  %765 = vmatpush3.msra.mxu1 %v394_v19  ;;  %v368_v29 = vld [vmem:[#allocation3 + $0x78] sm:$0xff]  ;;  %v366_v30 = vld [vmem:[#allocation3 + $0x68] sm:$0xff]  ;;  %v365_v32 = vld [vmem:[#allocation3 + $0x60] sm:$0xff] }
  0x31   : > { %410 = vmatpush1.msra.mxu0 %v386_v11  ;;  %766 = vmatprep.subr.mxu1 %v902_v5  ;;  %v382_v31 = vld [vmem:[#allocation3 + $0xe8] sm:$0xff]  ;;  %v363_v33 = vld [vmem:[#allocation3 + $0x50] sm:$0xff]  ;;  %v360_v36 = vld [vmem:[#allocation3 + $0x38] sm:$0xff] }
  0x32   : > { %411 = vmatprep.subr.mxu0 %v384_v12  ;;  %767 = vmatpush3.msra.mxu1 %v391_v22  ;;  %v379_v34 = vld [vmem:[#allocation3 + $0xd0] sm:$0xff]  ;;  %v362_v35 = vld [vmem:[#allocation3 + $0x48] sm:$0xff]  ;;  %v376_v37 = vld [vmem:[#allocation3 + $0xb8] sm:$0xff] }
  0x33   : > { %412 = vmatpush1.msra.mxu0 %v383_v13  ;;  %768 = vmatprep.subr.mxu1 %v902_v5  ;;  %v359_v38 = vld [vmem:[#allocation3 + $0x30] sm:$0xff]  ;;  %v357_v39 = vld [vmem:[#allocation3 + $0x20] sm:$0xff]  ;;  %v356_v41 = vld [vmem:[#allocation3 + $0x18] sm:$0xff] }
  0x34   : > { %413 = vmatprep.subr.mxu0 %v381_v14  ;;  %769 = vmatpush3.msra.mxu1 %v388_v25  ;;  %v373_v40 = vld [vmem:[#allocation3 + $0xa0] sm:$0xff]  ;;  %v354_v42 = vld [vmem:[#allocation3 + $0x8] sm:$0xff]  ;;  %v348_v45 = vld [vmem:[#allocation2] sm:$0x3] }
  0x35   : > { %414 = vmatpush1.msra.mxu0 %v380_v16  ;;  %770 = vmatprep.subr.mxu1 %v902_v5  ;;  %v370_v43 = vld [vmem:[#allocation3 + $0x88] sm:$0xff]  ;;  %v353_v44 = vld [vmem:[#allocation3] sm:$0xff]  ;;  %v367_v46 = vld [vmem:[#allocation3 + $0x70] sm:$0xff] }
  0x36   : > { %415 = vmatprep.subr.mxu0 %v378_v18  ;;  %771 = vmatpush3.msra.mxu1 %v385_v28  ;;  %v364_v47 = vld [vmem:[#allocation3 + $0x58] sm:$0xff]  ;;  %v361_v48 = vld [vmem:[#allocation3 + $0x40] sm:$0xff]  ;;  %v358_v49 = vld [vmem:[#allocation3 + $0x28] sm:$0xff] }
  0x37   : > { %416 = vmatpush1.msra.mxu0 %v377_v20  ;;  %772 = vmatprep.subr.mxu1 %v902_v5  ;;  %v355_v50 = vld [vmem:[#allocation3 + $0x10] sm:$0xff]  ;;  %v349_v51 = vld [vmem:[%s993_s18] sm:$0x7] }
  0x38   : > { %417 = vmatprep.subr.mxu0 %v375_v21  ;;  %773 = vmatpush3.msra.mxu1 %v382_v31  ;;  %v350_v52 = vunpack.c.l.bf16 %v349_v51  ;;  %v351_v53 = vld [vmem:[%s1043_s1] sm:$0x3f] }
  0x39   : > { %418 = vmatpush1.msra.mxu0 %v374_v23  ;;  %774 = vmatprep.subr.mxu1 %v902_v5  ;;  %v738_v3 = vld [vmem:[%s1046_s4] ss:$0 sm:$0xff] }
  0x3a   : > { %419 = vmatprep.subr.mxu0 %v372_v24  ;;  %775 = vmatpush3.msra.mxu1 %v379_v34  ;;  %v352_v54 = vadd.f32 %v351_v53, %v350_v52 }
  0x3b   : > { %420 = vmatpush1.msra.mxu0 %v371_v26  ;;  %776 = vmatprep.subr.mxu1 %v902_v5 }
  0x3c   : > { %421 = vmatprep.subr.mxu0 %v369_v27  ;;  %777 = vmatpush3.msra.mxu1 %v376_v37  ;;  %v550_v58 = vrot.slane %v352_v54, 2  ;;  %v568_v6 = vrot.slane %v352_v54, 4 }
  0x3d   : > { %422 = vmatpush1.msra.mxu0 %v368_v29  ;;  %778 = vmatprep.subr.mxu1 %v902_v5 }
  0x3e   : > { %423 = vmatprep.subr.mxu0 %v366_v30  ;;  %779 = vmatpush3.msra.mxu1 %v373_v40 }
  0x3f   : > { %424 = vmatpush1.msra.mxu0 %v365_v32  ;;  %780 = vmatprep.subr.mxu1 %v902_v5 }
  0x40   : > { %425 = vmatprep.subr.mxu0 %v363_v33  ;;  %781 = vmatpush3.msra.mxu1 %v370_v43 }
  0x41   : > { %426 = vmatpush1.msra.mxu0 %v362_v35  ;;  %782 = vmatprep.subr.mxu1 %v902_v5 }
  0x42   : > { %427 = vmatprep.subr.mxu0 %v360_v36  ;;  %783 = vmatpush3.msra.mxu1 %v367_v46 }
  0x43   : > { %428 = vmatpush1.msra.mxu0 %v359_v38  ;;  %784 = vmatprep.subr.mxu1 %v902_v5 }
  0x44   : > { %429 = vmatprep.subr.mxu0 %v357_v39  ;;  %785 = vmatpush3.msra.mxu1 %v364_v47 }
  0x45   : > { %430 = vmatpush1.msra.mxu0 %v356_v41  ;;  %786 = vmatprep.subr.mxu1 %v902_v5 }
  0x46   : > { %431 = vmatprep.subr.mxu0 %v354_v42  ;;  %787 = vmatpush3.msra.mxu1 %v361_v48 }
  0x47   : > { %432 = vmatpush1.msra.mxu0 %v353_v44  ;;  %788 = vmatprep.subr.mxu1 %v902_v5 }
  0x48   : > { %466 = vmatmul.mubr.f32.vlgmr.msra.gmra.mxu0 %v348_v45  ;;  %789 = vmatpush3.msra.mxu1 %v358_v49 }
  0x49   : > { %790 = vmatprep.subr.mxu1 %v902_v5 }
  0x4a   : > { %791 = vmatpush3.msra.mxu1 %v355_v50 }
  0x4b   : > { %793 = vmatmul.mubr.f32.vlgmr.msra.gmra.mxu1 %v348_v45 }
 0x108   : > { %v467_v55 = vpop.f32.mrf.mxu0 }
 0x109   : > { %v542_v56 = vadd.f32 %v467_v55, %v352_v54 }
 0x10a   : > { %v469_v59 = vpop.f32.mrf.mxu0 }
 0x10b   : > { %v736_v57 = vmul.f32 -1.442695, %v542_v56  ;;  %v552_v60 = vadd.f32 %v550_v58, %v469_v59  ;;  %v538_v61 = vpop.f32.mrf.mxu1 }
 0x10c   : > { %v566_v5 = vadd.f32 %v738_v3, %v538_v61 }
 0x10d   : > { %835 = vpow2.f32 %v736_v57  ;;  %v737_v62 = vmul.f32 -1.442695, %v552_v60  ;;  %v794_v63 = vpop.f32.mrf.mxu1 }
 0x10f   : > { %837 = vpow2.f32 %v737_v62 }
 0x11a   : > { %v836_v0 = vpop.eup %835 }
 0x11b   : > { %v546_v1 = vadd.f32 1.0, %v836_v0 }
 0x11c   : > { %v838_v2 = vpop.eup %837 }
 0x11d   : > { %839 = vrcp.f32 %v546_v1  ;;  %v556_v4 = vadd.f32 1.0, %v838_v2 }
 0x11f   : > { %841 = vrcp.f32 %v556_v4 }
 0x12a   : > { %v840_v7 = vpop.eup %839 }
 0x12b   : > { %v567_v8 = vmul.f32 %v840_v7, %v566_v5 }
 0x12c   : > { %v842_v10 = vpop.eup %841 }
 0x12d   : > { %v570_v9 = vadd.f32 %v568_v6, %v567_v8  ;;  %v572_v11 = vsub.f32 1.0, %v842_v10  ;;  %v574_v13 = vmul.f32 %v842_v10, %v348_v45 }
 0x12f   : > { %843 = vtanh.f32 %v570_v9 }
 0x13c   : > { %v844_v12 = vpop.eup %843 }
 0x13d   : > { %v573_v14 = vmul.f32 %v844_v12, %v572_v11 }
 0x13f   : > { %v575_v15 = vadd.f32 %v574_v13, %v573_v14  ;;  %582 = sbr.rel (%p739_p3) target bundleno = 325 (0x145), region = 52 }
 0x141   : > { %576 = vst [vmem:[#allocation2] sm:$0x3] %v575_v15  ;;  %v577_v16 = vpack.c.bf16 %v575_v15, %v575_v15 }
 0x143   : > { %578 = vst [vmem:[%s337_s15] sm:$0x1] %v577_v16 }
 0x144   : > { %583 = vst [vmem:[%s1048_s6] sm:$0x3] %v575_v15 }
 0x145 PF: > { %s18_s23 = sadd.s32 1, %s897_s23   ;;  %s1051_s21 = smov %s893_s22 }
 0x146   : > { %p15_p4 = scmp.ge.s32.totalorder %s18_s23, 10   ;;  %s1052_s22 = smov %s1054_s25 }
 0x148   :  { %17 = sbr.rel (!%p15_p4) target bundleno = 2 (0x2), region = 101 }
 0x14d   :  { %621 = vsyncpa [#allocation4], 1 }
 0x14e   :  { %623 = vsyncpa [#allocation4 + $0x1], 1 }

</bundles_post_ra>
